<compile_context>
chip_gen: v6e
topology: v6e:2x2x1
jax: 0.10.0
libtpu: 0.0.40
codegen_flags: <defaults>
</compile_context>

<pallas_src>
import functools

import jax
import jax.numpy as jnp
from jax.experimental import pallas as pl
from jax.experimental.pallas import tpu as pltpu

LANES = 128  # batch elements per lane-row


def simple_nn_kernel(x_ref, w1_ref, b1_ref, w2_ref, b2_ref, o_ref):
    # x_ref/o_ref: (tr, 128) f32 in VMEM; params: small 1-D f32 in SMEM.
    x = x_ref[...]
    hidden = w1_ref.shape[0]

    # Hoist the 3*H + 1 scalar SMEM reads out of the unrolled loop so their
    # splats into vregs happen once per grid step, not per strip-mined vreg.
    w1 = [w1_ref[j] for j in range(hidden)]
    b1 = [b1_ref[j] for j in range(hidden)]
    w2 = [w2_ref[j] for j in range(hidden)]

    acc = jnp.full_like(x, b2_ref[0])
    # Static unroll over the hidden units: pure VPU broadcast math,
    # no MXU push/pop, no cross-lane reduction.
    for j in range(hidden):
        h = jnp.maximum(x * w1[j] + b1[j], 0.0)
        acc = acc + h * w2[j]

    # sigmoid(z) == 0.5 * tanh(0.5 * z) + 0.5  -> 2 VALU ops + one EUP tanh.
    o_ref[...] = 0.5 * jnp.tanh(0.5 * acc) + 0.5


def _pick_tile_rows(n_rows, tile_rows):
    """Choose the row-tile size (trace-time Python ints only)."""
    if n_rows <= 8:
        # Single full-extent block (block dim == array dim is always legal).
        return n_rows
    # Multiple of 8 (sublane constraint), aim for >= 4 grid steps so the
    # pipeline overlaps DMA with compute (and both v7x TCs get work),
    # capped at tile_rows (default 2048 rows = 1 MiB f32 per tile).
    tr = min(tile_rows, max(8, (n_rows // 4) // 8 * 8))
    return tr


@functools.partial(jax.jit, static_argnames=("tile_rows",))
def simple_nn_forward(x, w1, b1, w2, b2, *, tile_rows=2048):
    """x: [B, 1] f32.  w1,b1,w2: [H] f32, b2: [1] f32.  Returns [B, 1] f32."""
    B = x.shape[0]

    n_rows = max(pl.cdiv(B, LANES), 1)
    padded = n_rows * LANES

    xf = x.reshape(-1)
    if padded != B:
        # Pad only to the next multiple of 128; row-axis raggedness beyond
        # that is handled by Pallas' padded last block.
        xf = jnp.pad(xf, (0, padded - B))
    x2 = xf.reshape(n_rows, LANES)

    tr = _pick_tile_rows(n_rows, tile_rows)
    grid = (pl.cdiv(n_rows, tr),)

    smem_spec = pl.BlockSpec(memory_space=pltpu.MemorySpace.SMEM)

    out2 = pl.pallas_call(
        simple_nn_kernel,
        out_shape=jax.ShapeDtypeStruct((n_rows, LANES), jnp.float32),
        grid=grid,
        in_specs=[
            pl.BlockSpec((tr, LANES), lambda i: (i, 0)),  # lane-dense batch tile
            smem_spec,  # w1  (H,)
            smem_spec,  # b1  (H,)
            smem_spec,  # w2  (H,)
            smem_spec,  # b2  (1,)
        ],
        out_specs=pl.BlockSpec((tr, LANES), lambda i: (i, 0)),
        compiler_params=pltpu.CompilerParams(
            dimension_semantics=("parallel",),  # shards batch grid on v7x megacore
        ),
    )(x2, w1, b1, w2, b2)

    out = out2.reshape(-1)
    if padded != B:
        out = out[:B]  # drop the padded tail (bounded garbage, never NaN)
    return out.reshape(B, 1)


def init_params(key, input_size=1, hidden_size=16):
    # PyTorch nn.Linear default init: U(-1/sqrt(fan_in), 1/sqrt(fan_in)).
    # Since input_size == 1, layer1.weight[:, 0] is stored flat as w1 (H,).
    k1, k2, k3, k4 = jax.random.split(key, 4)
    bound1 = 1.0 / jnp.sqrt(jnp.float32(input_size))
    bound2 = 1.0 / jnp.sqrt(jnp.float32(hidden_size))
    w1 = jax.random.uniform(k1, (hidden_size,), jnp.float32, -bound1, bound1)
    b1 = jax.random.uniform(k2, (hidden_size,), jnp.float32, -bound1, bound1)
    w2 = jax.random.uniform(k3, (hidden_size,), jnp.float32, -bound2, bound2)
    b2 = jax.random.uniform(k4, (1,), jnp.float32, -bound2, bound2)
    return w1, b1, w2, b2


def reference(x, w1, b1, w2, b2):
    # Plain-JAX reference of the PyTorch forward pass. x: [B, 1] (or [B]).
    xb = x.reshape(-1, 1).astype(jnp.float32)                 # [B, 1]
    h = jnp.maximum(xb * w1[None, :] + b1[None, :], 0.0)      # [B, H]
    y = h @ w2[:, None] + b2[None, :]                         # [B, 1]
    return jax.nn.sigmoid(y)


if __name__ == "__main__":
    key = jax.random.PRNGKey(0)
    k_x1, k_x2, k_x3, k_p = jax.random.split(key, 4)

    hidden_size = 16
    w1, b1, w2, b2 = init_params(k_p, input_size=1, hidden_size=hidden_size)

    # Small batch: single (1, 128) tile with padded tail lanes.
    B = 8
    x = jax.random.normal(k_x1, (B, 1), jnp.float32)
    out = jax.block_until_ready(simple_nn_forward(x, w1, b1, w2, b2))
    ref = reference(x, w1, b1, w2, b2)
    assert out.shape == (B, 1)
    assert jnp.allclose(out, ref, atol=1e-5), "mismatch vs reference (B=8)"

    # Lane-aligned fast path: B % 128 == 0, no pad / no slice.
    B2 = 256
    x2 = jax.random.normal(k_x2, (B2, 1), jnp.float32)
    out2 = jax.block_until_ready(simple_nn_forward(x2, w1, b1, w2, b2))
    ref2 = reference(x2, w1, b1, w2, b2)
    assert out2.shape == (B2, 1)
    assert jnp.allclose(out2, ref2, atol=1e-5), "mismatch vs reference (B=256)"

    # Larger batch: multi-step grid + ragged (non-dividing) last block.
    B3 = 2400
    x3 = jax.random.normal(k_x3, (B3, 1), jnp.float32)
    out3 = jax.block_until_ready(simple_nn_forward(x3, w1, b1, w2, b2))
    ref3 = reference(x3, w1, b1, w2, b2)
    assert out3.shape == (B3, 1)
    assert jnp.allclose(out3, ref3, atol=1e-5), "mismatch vs reference (B=2400)"

    print("KERNEL_OK")
</pallas_src>

<mosaic_0001>
module attributes {stable_mosaic.version = 11 : i64} {
  func.func @simple_nn_kernel(%arg0: i32, %arg1: memref<1x128xf32, #tpu.memory_space<vmem>>, %arg2: memref<16xf32, #tpu.memory_space<smem>>, %arg3: memref<16xf32, #tpu.memory_space<smem>>, %arg4: memref<16xf32, #tpu.memory_space<smem>>, %arg5: memref<1xf32, #tpu.memory_space<smem>>, %arg6: memref<1x128xf32, #tpu.memory_space<vmem>>) attributes {dimension_semantics = [#tpu.dimension_semantics<parallel>], iteration_bounds = array<i64: 1>, scalar_prefetch = 0 : i64, scratch_operands = 0 : i64, tpu.core_type = #tpu.core_type<tc>, window_params = [{transform_indices = @transform_0, window_bounds = array<i64: 1, 128>}, {transform_indices = @transform_1, window_bounds = array<i64: 16>}, {transform_indices = @transform_2, window_bounds = array<i64: 16>}, {transform_indices = @transform_3, window_bounds = array<i64: 16>}, {transform_indices = @transform_4, window_bounds = array<i64: 1>}, {transform_indices = @transform_5, window_bounds = array<i64: 1, 128>}]} {
    %c0 = arith.constant 0 : index
    %c0_0 = arith.constant 0 : index
    %0 = vector.load %arg1[%c0, %c0_0] : memref<1x128xf32, #tpu.memory_space<vmem>>, vector<1x128xf32>
    %c0_1 = arith.constant 0 : index
    %1 = memref.load %arg2[%c0_1] : memref<16xf32, #tpu.memory_space<smem>>
    %c1 = arith.constant 1 : index
    %2 = memref.load %arg2[%c1] : memref<16xf32, #tpu.memory_space<smem>>
    %c2 = arith.constant 2 : index
    %3 = memref.load %arg2[%c2] : memref<16xf32, #tpu.memory_space<smem>>
    %c3 = arith.constant 3 : index
    %4 = memref.load %arg2[%c3] : memref<16xf32, #tpu.memory_space<smem>>
    %c4 = arith.constant 4 : index
    %5 = memref.load %arg2[%c4] : memref<16xf32, #tpu.memory_space<smem>>
    %c5 = arith.constant 5 : index
    %6 = memref.load %arg2[%c5] : memref<16xf32, #tpu.memory_space<smem>>
    %c6 = arith.constant 6 : index
    %7 = memref.load %arg2[%c6] : memref<16xf32, #tpu.memory_space<smem>>
    %c7 = arith.constant 7 : index
    %8 = memref.load %arg2[%c7] : memref<16xf32, #tpu.memory_space<smem>>
    %c8 = arith.constant 8 : index
    %9 = memref.load %arg2[%c8] : memref<16xf32, #tpu.memory_space<smem>>
    %c9 = arith.constant 9 : index
    %10 = memref.load %arg2[%c9] : memref<16xf32, #tpu.memory_space<smem>>
    %c10 = arith.constant 10 : index
    %11 = memref.load %arg2[%c10] : memref<16xf32, #tpu.memory_space<smem>>
    %c11 = arith.constant 11 : index
    %12 = memref.load %arg2[%c11] : memref<16xf32, #tpu.memory_space<smem>>
    %c12 = arith.constant 12 : index
    %13 = memref.load %arg2[%c12] : memref<16xf32, #tpu.memory_space<smem>>
    %c13 = arith.constant 13 : index
    %14 = memref.load %arg2[%c13] : memref<16xf32, #tpu.memory_space<smem>>
    %c14 = arith.constant 14 : index
    %15 = memref.load %arg2[%c14] : memref<16xf32, #tpu.memory_space<smem>>
    %c15 = arith.constant 15 : index
    %16 = memref.load %arg2[%c15] : memref<16xf32, #tpu.memory_space<smem>>
    %c0_2 = arith.constant 0 : index
    %17 = memref.load %arg3[%c0_2] : memref<16xf32, #tpu.memory_space<smem>>
    %c1_3 = arith.constant 1 : index
    %18 = memref.load %arg3[%c1_3] : memref<16xf32, #tpu.memory_space<smem>>
    %c2_4 = arith.constant 2 : index
    %19 = memref.load %arg3[%c2_4] : memref<16xf32, #tpu.memory_space<smem>>
    %c3_5 = arith.constant 3 : index
    %20 = memref.load %arg3[%c3_5] : memref<16xf32, #tpu.memory_space<smem>>
    %c4_6 = arith.constant 4 : index
    %21 = memref.load %arg3[%c4_6] : memref<16xf32, #tpu.memory_space<smem>>
    %c5_7 = arith.constant 5 : index
    %22 = memref.load %arg3[%c5_7] : memref<16xf32, #tpu.memory_space<smem>>
    %c6_8 = arith.constant 6 : index
    %23 = memref.load %arg3[%c6_8] : memref<16xf32, #tpu.memory_space<smem>>
    %c7_9 = arith.constant 7 : index
    %24 = memref.load %arg3[%c7_9] : memref<16xf32, #tpu.memory_space<smem>>
    %c8_10 = arith.constant 8 : index
    %25 = memref.load %arg3[%c8_10] : memref<16xf32, #tpu.memory_space<smem>>
    %c9_11 = arith.constant 9 : index
    %26 = memref.load %arg3[%c9_11] : memref<16xf32, #tpu.memory_space<smem>>
    %c10_12 = arith.constant 10 : index
    %27 = memref.load %arg3[%c10_12] : memref<16xf32, #tpu.memory_space<smem>>
    %c11_13 = arith.constant 11 : index
    %28 = memref.load %arg3[%c11_13] : memref<16xf32, #tpu.memory_space<smem>>
    %c12_14 = arith.constant 12 : index
    %29 = memref.load %arg3[%c12_14] : memref<16xf32, #tpu.memory_space<smem>>
    %c13_15 = arith.constant 13 : index
    %30 = memref.load %arg3[%c13_15] : memref<16xf32, #tpu.memory_space<smem>>
    %c14_16 = arith.constant 14 : index
    %31 = memref.load %arg3[%c14_16] : memref<16xf32, #tpu.memory_space<smem>>
    %c15_17 = arith.constant 15 : index
    %32 = memref.load %arg3[%c15_17] : memref<16xf32, #tpu.memory_space<smem>>
    %c0_18 = arith.constant 0 : index
    %33 = memref.load %arg4[%c0_18] : memref<16xf32, #tpu.memory_space<smem>>
    %c1_19 = arith.constant 1 : index
    %34 = memref.load %arg4[%c1_19] : memref<16xf32, #tpu.memory_space<smem>>
    %c2_20 = arith.constant 2 : index
    %35 = memref.load %arg4[%c2_20] : memref<16xf32, #tpu.memory_space<smem>>
    %c3_21 = arith.constant 3 : index
    %36 = memref.load %arg4[%c3_21] : memref<16xf32, #tpu.memory_space<smem>>
    %c4_22 = arith.constant 4 : index
    %37 = memref.load %arg4[%c4_22] : memref<16xf32, #tpu.memory_space<smem>>
    %c5_23 = arith.constant 5 : index
    %38 = memref.load %arg4[%c5_23] : memref<16xf32, #tpu.memory_space<smem>>
    %c6_24 = arith.constant 6 : index
    %39 = memref.load %arg4[%c6_24] : memref<16xf32, #tpu.memory_space<smem>>
    %c7_25 = arith.constant 7 : index
    %40 = memref.load %arg4[%c7_25] : memref<16xf32, #tpu.memory_space<smem>>
    %c8_26 = arith.constant 8 : index
    %41 = memref.load %arg4[%c8_26] : memref<16xf32, #tpu.memory_space<smem>>
    %c9_27 = arith.constant 9 : index
    %42 = memref.load %arg4[%c9_27] : memref<16xf32, #tpu.memory_space<smem>>
    %c10_28 = arith.constant 10 : index
    %43 = memref.load %arg4[%c10_28] : memref<16xf32, #tpu.memory_space<smem>>
    %c11_29 = arith.constant 11 : index
    %44 = memref.load %arg4[%c11_29] : memref<16xf32, #tpu.memory_space<smem>>
    %c12_30 = arith.constant 12 : index
    %45 = memref.load %arg4[%c12_30] : memref<16xf32, #tpu.memory_space<smem>>
    %c13_31 = arith.constant 13 : index
    %46 = memref.load %arg4[%c13_31] : memref<16xf32, #tpu.memory_space<smem>>
    %c14_32 = arith.constant 14 : index
    %47 = memref.load %arg4[%c14_32] : memref<16xf32, #tpu.memory_space<smem>>
    %c15_33 = arith.constant 15 : index
    %48 = memref.load %arg4[%c15_33] : memref<16xf32, #tpu.memory_space<smem>>
    %c0_34 = arith.constant 0 : index
    %49 = memref.load %arg5[%c0_34] : memref<1xf32, #tpu.memory_space<smem>>
    %50 = vector.broadcast %49 : f32 to vector<1x128xf32>
    %51 = vector.broadcast %1 : f32 to vector<1x128xf32>
    %52 = arith.mulf %0, %51 : vector<1x128xf32>
    %53 = vector.broadcast %17 : f32 to vector<1x128xf32>
    %54 = arith.addf %52, %53 : vector<1x128xf32>
    %cst = arith.constant 0.000000e+00 : f32
    %55 = vector.broadcast %cst : f32 to vector<1x128xf32>
    %56 = arith.maximumf %54, %55 : vector<1x128xf32>
    %57 = vector.broadcast %33 : f32 to vector<1x128xf32>
    %58 = arith.mulf %56, %57 : vector<1x128xf32>
    %59 = arith.addf %50, %58 : vector<1x128xf32>
    %60 = vector.broadcast %2 : f32 to vector<1x128xf32>
    %61 = arith.mulf %0, %60 : vector<1x128xf32>
    %62 = vector.broadcast %18 : f32 to vector<1x128xf32>
    %63 = arith.addf %61, %62 : vector<1x128xf32>
    %cst_35 = arith.constant 0.000000e+00 : f32
    %64 = vector.broadcast %cst_35 : f32 to vector<1x128xf32>
    %65 = arith.maximumf %63, %64 : vector<1x128xf32>
    %66 = vector.broadcast %34 : f32 to vector<1x128xf32>
    %67 = arith.mulf %65, %66 : vector<1x128xf32>
    %68 = arith.addf %59, %67 : vector<1x128xf32>
    %69 = vector.broadcast %3 : f32 to vector<1x128xf32>
    %70 = arith.mulf %0, %69 : vector<1x128xf32>
    %71 = vector.broadcast %19 : f32 to vector<1x128xf32>
    %72 = arith.addf %70, %71 : vector<1x128xf32>
    %cst_36 = arith.constant 0.000000e+00 : f32
    %73 = vector.broadcast %cst_36 : f32 to vector<1x128xf32>
    %74 = arith.maximumf %72, %73 : vector<1x128xf32>
    %75 = vector.broadcast %35 : f32 to vector<1x128xf32>
    %76 = arith.mulf %74, %75 : vector<1x128xf32>
    %77 = arith.addf %68, %76 : vector<1x128xf32>
    %78 = vector.broadcast %4 : f32 to vector<1x128xf32>
    %79 = arith.mulf %0, %78 : vector<1x128xf32>
    %80 = vector.broadcast %20 : f32 to vector<1x128xf32>
    %81 = arith.addf %79, %80 : vector<1x128xf32>
    %cst_37 = arith.constant 0.000000e+00 : f32
    %82 = vector.broadcast %cst_37 : f32 to vector<1x128xf32>
    %83 = arith.maximumf %81, %82 : vector<1x128xf32>
    %84 = vector.broadcast %36 : f32 to vector<1x128xf32>
    %85 = arith.mulf %83, %84 : vector<1x128xf32>
    %86 = arith.addf %77, %85 : vector<1x128xf32>
    %87 = vector.broadcast %5 : f32 to vector<1x128xf32>
    %88 = arith.mulf %0, %87 : vector<1x128xf32>
    %89 = vector.broadcast %21 : f32 to vector<1x128xf32>
    %90 = arith.addf %88, %89 : vector<1x128xf32>
    %cst_38 = arith.constant 0.000000e+00 : f32
    %91 = vector.broadcast %cst_38 : f32 to vector<1x128xf32>
    %92 = arith.maximumf %90, %91 : vector<1x128xf32>
    %93 = vector.broadcast %37 : f32 to vector<1x128xf32>
    %94 = arith.mulf %92, %93 : vector<1x128xf32>
    %95 = arith.addf %86, %94 : vector<1x128xf32>
    %96 = vector.broadcast %6 : f32 to vector<1x128xf32>
    %97 = arith.mulf %0, %96 : vector<1x128xf32>
    %98 = vector.broadcast %22 : f32 to vector<1x128xf32>
    %99 = arith.addf %97, %98 : vector<1x128xf32>
    %cst_39 = arith.constant 0.000000e+00 : f32
    %100 = vector.broadcast %cst_39 : f32 to vector<1x128xf32>
    %101 = arith.maximumf %99, %100 : vector<1x128xf32>
    %102 = vector.broadcast %38 : f32 to vector<1x128xf32>
    %103 = arith.mulf %101, %102 : vector<1x128xf32>
    %104 = arith.addf %95, %103 : vector<1x128xf32>
    %105 = vector.broadcast %7 : f32 to vector<1x128xf32>
    %106 = arith.mulf %0, %105 : vector<1x128xf32>
    %107 = vector.broadcast %23 : f32 to vector<1x128xf32>
    %108 = arith.addf %106, %107 : vector<1x128xf32>
    %cst_40 = arith.constant 0.000000e+00 : f32
    %109 = vector.broadcast %cst_40 : f32 to vector<1x128xf32>
    %110 = arith.maximumf %108, %109 : vector<1x128xf32>
    %111 = vector.broadcast %39 : f32 to vector<1x128xf32>
    %112 = arith.mulf %110, %111 : vector<1x128xf32>
    %113 = arith.addf %104, %112 : vector<1x128xf32>
    %114 = vector.broadcast %8 : f32 to vector<1x128xf32>
    %115 = arith.mulf %0, %114 : vector<1x128xf32>
    %116 = vector.broadcast %24 : f32 to vector<1x128xf32>
    %117 = arith.addf %115, %116 : vector<1x128xf32>
    %cst_41 = arith.constant 0.000000e+00 : f32
    %118 = vector.broadcast %cst_41 : f32 to vector<1x128xf32>
    %119 = arith.maximumf %117, %118 : vector<1x128xf32>
    %120 = vector.broadcast %40 : f32 to vector<1x128xf32>
    %121 = arith.mulf %119, %120 : vector<1x128xf32>
    %122 = arith.addf %113, %121 : vector<1x128xf32>
    %123 = vector.broadcast %9 : f32 to vector<1x128xf32>
    %124 = arith.mulf %0, %123 : vector<1x128xf32>
    %125 = vector.broadcast %25 : f32 to vector<1x128xf32>
    %126 = arith.addf %124, %125 : vector<1x128xf32>
    %cst_42 = arith.constant 0.000000e+00 : f32
    %127 = vector.broadcast %cst_42 : f32 to vector<1x128xf32>
    %128 = arith.maximumf %126, %127 : vector<1x128xf32>
    %129 = vector.broadcast %41 : f32 to vector<1x128xf32>
    %130 = arith.mulf %128, %129 : vector<1x128xf32>
    %131 = arith.addf %122, %130 : vector<1x128xf32>
    %132 = vector.broadcast %10 : f32 to vector<1x128xf32>
    %133 = arith.mulf %0, %132 : vector<1x128xf32>
    %134 = vector.broadcast %26 : f32 to vector<1x128xf32>
    %135 = arith.addf %133, %134 : vector<1x128xf32>
    %cst_43 = arith.constant 0.000000e+00 : f32
    %136 = vector.broadcast %cst_43 : f32 to vector<1x128xf32>
    %137 = arith.maximumf %135, %136 : vector<1x128xf32>
    %138 = vector.broadcast %42 : f32 to vector<1x128xf32>
    %139 = arith.mulf %137, %138 : vector<1x128xf32>
    %140 = arith.addf %131, %139 : vector<1x128xf32>
    %141 = vector.broadcast %11 : f32 to vector<1x128xf32>
    %142 = arith.mulf %0, %141 : vector<1x128xf32>
    %143 = vector.broadcast %27 : f32 to vector<1x128xf32>
    %144 = arith.addf %142, %143 : vector<1x128xf32>
    %cst_44 = arith.constant 0.000000e+00 : f32
    %145 = vector.broadcast %cst_44 : f32 to vector<1x128xf32>
    %146 = arith.maximumf %144, %145 : vector<1x128xf32>
    %147 = vector.broadcast %43 : f32 to vector<1x128xf32>
    %148 = arith.mulf %146, %147 : vector<1x128xf32>
    %149 = arith.addf %140, %148 : vector<1x128xf32>
    %150 = vector.broadcast %12 : f32 to vector<1x128xf32>
    %151 = arith.mulf %0, %150 : vector<1x128xf32>
    %152 = vector.broadcast %28 : f32 to vector<1x128xf32>
    %153 = arith.addf %151, %152 : vector<1x128xf32>
    %cst_45 = arith.constant 0.000000e+00 : f32
    %154 = vector.broadcast %cst_45 : f32 to vector<1x128xf32>
    %155 = arith.maximumf %153, %154 : vector<1x128xf32>
    %156 = vector.broadcast %44 : f32 to vector<1x128xf32>
    %157 = arith.mulf %155, %156 : vector<1x128xf32>
    %158 = arith.addf %149, %157 : vector<1x128xf32>
    %159 = vector.broadcast %13 : f32 to vector<1x128xf32>
    %160 = arith.mulf %0, %159 : vector<1x128xf32>
    %161 = vector.broadcast %29 : f32 to vector<1x128xf32>
    %162 = arith.addf %160, %161 : vector<1x128xf32>
    %cst_46 = arith.constant 0.000000e+00 : f32
    %163 = vector.broadcast %cst_46 : f32 to vector<1x128xf32>
    %164 = arith.maximumf %162, %163 : vector<1x128xf32>
    %165 = vector.broadcast %45 : f32 to vector<1x128xf32>
    %166 = arith.mulf %164, %165 : vector<1x128xf32>
    %167 = arith.addf %158, %166 : vector<1x128xf32>
    %168 = vector.broadcast %14 : f32 to vector<1x128xf32>
    %169 = arith.mulf %0, %168 : vector<1x128xf32>
    %170 = vector.broadcast %30 : f32 to vector<1x128xf32>
    %171 = arith.addf %169, %170 : vector<1x128xf32>
    %cst_47 = arith.constant 0.000000e+00 : f32
    %172 = vector.broadcast %cst_47 : f32 to vector<1x128xf32>
    %173 = arith.maximumf %171, %172 : vector<1x128xf32>
    %174 = vector.broadcast %46 : f32 to vector<1x128xf32>
    %175 = arith.mulf %173, %174 : vector<1x128xf32>
    %176 = arith.addf %167, %175 : vector<1x128xf32>
    %177 = vector.broadcast %15 : f32 to vector<1x128xf32>
    %178 = arith.mulf %0, %177 : vector<1x128xf32>
    %179 = vector.broadcast %31 : f32 to vector<1x128xf32>
    %180 = arith.addf %178, %179 : vector<1x128xf32>
    %cst_48 = arith.constant 0.000000e+00 : f32
    %181 = vector.broadcast %cst_48 : f32 to vector<1x128xf32>
    %182 = arith.maximumf %180, %181 : vector<1x128xf32>
    %183 = vector.broadcast %47 : f32 to vector<1x128xf32>
    %184 = arith.mulf %182, %183 : vector<1x128xf32>
    %185 = arith.addf %176, %184 : vector<1x128xf32>
    %186 = vector.broadcast %16 : f32 to vector<1x128xf32>
    %187 = arith.mulf %0, %186 : vector<1x128xf32>
    %188 = vector.broadcast %32 : f32 to vector<1x128xf32>
    %189 = arith.addf %187, %188 : vector<1x128xf32>
    %cst_49 = arith.constant 0.000000e+00 : f32
    %190 = vector.broadcast %cst_49 : f32 to vector<1x128xf32>
    %191 = arith.maximumf %189, %190 : vector<1x128xf32>
    %192 = vector.broadcast %48 : f32 to vector<1x128xf32>
    %193 = arith.mulf %191, %192 : vector<1x128xf32>
    %194 = arith.addf %185, %193 : vector<1x128xf32>
    %cst_50 = arith.constant 5.000000e-01 : f32
    %195 = vector.broadcast %cst_50 : f32 to vector<1x128xf32>
    %196 = arith.mulf %195, %194 : vector<1x128xf32>
    %197 = math.tanh %196 : vector<1x128xf32>
    %cst_51 = arith.constant 5.000000e-01 : f32
    %198 = vector.broadcast %cst_51 : f32 to vector<1x128xf32>
    %199 = arith.mulf %198, %197 : vector<1x128xf32>
    %cst_52 = arith.constant 5.000000e-01 : f32
    %200 = vector.broadcast %cst_52 : f32 to vector<1x128xf32>
    %201 = arith.addf %199, %200 : vector<1x128xf32>
    %c0_53 = arith.constant 0 : index
    %c0_54 = arith.constant 0 : index
    %202 = vector.load %arg6[%c0_53, %c0_54] : memref<1x128xf32, #tpu.memory_space<vmem>>, vector<1x128xf32>
    tpu.vector_store %arg6[%c0_53, %c0_54], %201 {strides = array<i32>} : memref<1x128xf32, #tpu.memory_space<vmem>>, vector<1x128xf32>,
    return
  }
  func.func @transform_0(%arg0: i32) -> (i32, i32) {
    %c0_i32 = arith.constant 0 : i32
    %c0_i32_0 = arith.constant 0 : i32
    return %arg0, %c0_i32 : i32, i32
  }
  func.func @transform_1(%arg0: i32) -> i32 {
    %c0_i32 = arith.constant 0 : i32
    %c0_i32_0 = arith.constant 0 : i32
    return %c0_i32 : i32
  }
  func.func @transform_2(%arg0: i32) -> i32 {
    %c0_i32 = arith.constant 0 : i32
    %c0_i32_0 = arith.constant 0 : i32
    return %c0_i32 : i32
  }
  func.func @transform_3(%arg0: i32) -> i32 {
    %c0_i32 = arith.constant 0 : i32
    %c0_i32_0 = arith.constant 0 : i32
    return %c0_i32 : i32
  }
  func.func @transform_4(%arg0: i32) -> i32 {
    %c0_i32 = arith.constant 0 : i32
    %c0_i32_0 = arith.constant 0 : i32
    return %c0_i32 : i32
  }
  func.func @transform_5(%arg0: i32) -> (i32, i32) {
    %c0_i32 = arith.constant 0 : i32
    %c0_i32_0 = arith.constant 0 : i32
    return %arg0, %c0_i32 : i32, i32
  }
}

</mosaic_0001>

<bundles_post_ra>
// kernel: simple_nn_forward.1
= control target key start
LH: loop header
LB: loop body
LE: loop exit
PB: predicated region body
PF: predicated region fallthrough
CT: control target
= control target key end

     0   :  { %11 = vsyncpa [#allocation4], 0  ;;  %s529_s0 = inlined_call_operand.vmem [shape: f32[1,128], index: 0, kind: input, shape index: {}]   ;;  %s530_s1 = inlined_call_operand.vmem [shape: f32[16], index: 1, kind: input, shape index: {}]   ;;  %s531_s2 = inlined_call_operand.vmem [shape: f32[16], index: 2, kind: input, shape index: {}]   ;;  %s532_s3 = inlined_call_operand.vmem [shape: f32[16], index: 3, kind: input, shape index: {}]   ;;  %s533_s4 = inlined_call_operand.<no memory space> [shape: f32[1], index: 4, kind: input, shape index: {}]   ;;  %s534_s5 = inlined_call_operand.vmem [shape: f32[1,128], index: 5, kind: output, shape index: {}]  }
   0x1   :  { %12 = vsyncpa [#allocation6], 0  ;;  %s31_s20 = sshll.u32 %s531_s2, 4  ;;  %s21_s23 = sshll.u32 %s530_s1, 4  ;;  %s32_s20 = int_to_ptr.vmem [resolvable:$true] %s31_s20  ;;  %s22_s23 = int_to_ptr.vmem [resolvable:$true] %s21_s23 }
   0x2   :  { %s297_s24 = scalar_lea.vmem %s32_s20, 16  ;;  %p302_p1 = scmp.lt.s32.totalorder %s32_s20, %s32_s20 }
   0x3   :  { %p298_p0 = scmp.ne.s32.totalorder %s32_s20, %s297_s24  ;;  %p303_p2 = scmp.lt.s32.totalorder %s297_s24, %s297_s24 }
   0x5   :  { %p304_p3 = por %p303_p2, %p302_p1 }
   0x7   :  { %p305_p4 = pnand %p304_p3, %p298_p0 }
   0x9   :  { %308 = shalt.err (!%p305_p4)
}
   0xa   :  { %s337_s25 = smov [#allocation5]   ;;  %s309_s26 = scalar_lea.vmem %s22_s23, 16 }
   0xb   :  { %34 = dma.vmem_to_smem %s32_s20, 16, %s337_s25, [#allocation6]  }
   0xc   :  { %p310_p5 = scmp.ne.s32.totalorder %s22_s23, %s309_s26  ;;  %p314_p6 = scmp.lt.s32.totalorder %s22_s23, %s22_s23 }
   0xd   :  { %p315_p7 = scmp.lt.s32.totalorder %s309_s26, %s309_s26 }
   0xf   :  { %p316_p8 = por %p315_p7, %p314_p6 }
  0x11   :  { %p317_p9 = pnand %p316_p8, %p310_p5 }
  0x13   :  { %320 = shalt.err (!%p317_p9)
}
  0x14   :  { %s338_s2 = smov [#allocation3]   ;;  %s41_s28 = sshll.u32 %s532_s3, 4  ;;  %s42_s28 = int_to_ptr.vmem [resolvable:$true] %s41_s28 }
  0x15   :  { %24 = dma.vmem_to_smem %s22_s23, 16, %s338_s2, [#allocation4]  }
  0x16   :  { %s321_s29 = scalar_lea.vmem %s42_s28, 16  ;;  %p326_p11 = scmp.lt.s32.totalorder %s42_s28, %s42_s28 }
  0x17   :  { %p322_p10 = scmp.ne.s32.totalorder %s42_s28, %s321_s29  ;;  %p327_p12 = scmp.lt.s32.totalorder %s321_s29, %s321_s29 }
  0x19   :  { %p328_p13 = por %p327_p12, %p326_p11 }
  0x1b   :  { %p329_p0 = pnand %p328_p13, %p322_p10 }
  0x1d   :  { %332 = shalt.err (!%p329_p0)
}
  0x1e   :  { %s339_s30 = smov [#allocation7]  }
  0x1f   :  { %44 = dma.vmem_to_smem %s42_s28, 16, %s339_s30, [#allocation6]  }
  0x20   :  { %333 = dma.done.wait [#allocation4], 16  }
  0x21   :  { %334 = vsyncadd [#allocation4], 4294967280 }
  0x22   :  { %335 = dma.done.wait [#allocation6], 32  }
  0x23   :  { %336 = vsyncadd [#allocation6], 4294967264 }
  0x24   :  { %56 = sfence }
  0x25   :  { %s58_s6 = sld [smem:[#allocation3]]  ;;  %v410_v0 = vld [vmem:[%s529_s0] sm:$0x1]  ;;  %v107_v26 = vstv %s533_s4 }
  0x26   :  { %s247_s7 = sld [smem:[#allocation3 + $0x1]] }
  0x27   :  { %s379_s8 = sld [smem:[#allocation3 + $0x2]] }
  0x28   :  { %s381_s3 = sld [smem:[#allocation3 + $0x3]] }
  0x29   :  { %s383_s9 = sld [smem:[#allocation3 + $0x4]] }
  0x2a   :  { %s385_s10 = sld [smem:[#allocation3 + $0x5]] }
  0x2b   :  { %s387_s11 = sld [smem:[#allocation3 + $0x6]]  ;;  %v108_v1 = vstv %s58_s6 }
  0x2c   :  { %s389_s12 = sld [smem:[#allocation3 + $0x7]]  ;;  %v116_v2 = vstv %s247_s7  ;;  %v109_v4 = vmul.f32 %v108_v1, %v410_v0 }
  0x2d   :  { %s391_s13 = sld [smem:[#allocation3 + $0x8]]  ;;  %v124_v3 = vstv %s379_s8  ;;  %v117_v6 = vmul.f32 %v116_v2, %v410_v0 }
  0x2e   :  { %s393_s14 = sld [smem:[#allocation3 + $0x9]]  ;;  %v132_v7 = vstv %s381_s3  ;;  %v125_v9 = vmul.f32 %v124_v3, %v410_v0 }
  0x2f   :  { %s395_s15 = sld [smem:[#allocation3 + $0xa]]  ;;  %v140_v10 = vstv %s383_s9  ;;  %v133_v13 = vmul.f32 %v132_v7, %v410_v0 }
  0x30   :  { %s397_s16 = sld [smem:[#allocation3 + $0xb]]  ;;  %v141_v16 = vmul.f32 %v140_v10, %v410_v0  ;;  %v148_v17 = vstv %s385_s10 }
  0x31   :  { %s399_s17 = sld [smem:[#allocation3 + $0xc]]  ;;  %v156_v20 = vstv %s387_s11  ;;  %v149_v25 = vmul.f32 %v148_v17, %v410_v0 }
  0x32   :  { %s401_s18 = sld [smem:[#allocation3 + $0xd]]  ;;  %v164_v21 = vstv %s389_s12  ;;  %v157_v31 = vmul.f32 %v156_v20, %v410_v0 }
  0x33   :  { %s403_s19 = sld [smem:[#allocation3 + $0xe]]  ;;  %v172_v22 = vstv %s391_s13  ;;  %v165_v32 = vmul.f32 %v164_v21, %v410_v0 }
  0x34   :  { %s74_s20 = sld [smem:[#allocation5]]  ;;  %v173_v33 = vmul.f32 %v172_v22, %v410_v0  ;;  %v180_v36 = vstv %s393_s14 }
  0x35   :  { %s262_s21 = sld [smem:[#allocation5 + $0x1]]  ;;  %v188_v37 = vstv %s395_s15  ;;  %v181_v52 = vmul.f32 %v180_v36, %v410_v0 }
  0x36   :  { %s263_s22 = sld [smem:[#allocation5 + $0x2]]  ;;  %v196_v53 = vstv %s397_s16  ;;  %v189_v60 = vmul.f32 %v188_v37, %v410_v0 }
  0x37   :  { %s405_s23 = sld [smem:[#allocation3 + $0xf]]  ;;  %v204_v61 = vstv %s399_s17 }
  0x38   :  { %s412_s26 = sld [smem:[#allocation5 + $0x3]] }
  0x39   :  { %s414_s2 = sld [smem:[#allocation5 + $0x4]] }
  0x3a   :  { %s416_s1 = sld [smem:[#allocation5 + $0x5]]  ;;  %v110_v5 = vstv %s74_s20 }
  0x3b   :  { %s419_s27 = sld [smem:[#allocation5 + $0x6]]  ;;  %v118_v8 = vstv %s262_s21  ;;  %v111_v12 = vadd.f32 %v110_v5, %v109_v4  ;;  %v197_v5 = vmul.f32 %v196_v53, %v410_v0 }
  0x3c   :  { %s422_s28 = sld [smem:[#allocation5 + $0x7]]  ;;  %v126_v11 = vstv %s263_s22  ;;  %v119_v14 = vadd.f32 %v118_v8, %v117_v6  ;;  %v212_v6 = vstv %s401_s18 }
  0x3d   :  { %s426_s0 = sld [smem:[#allocation5 + $0x8]]  ;;  %v127_v18 = vadd.f32 %v126_v11, %v125_v9  ;;  %v112_v23 = vmax.f32 %v111_v12, 0.0  ;;  %v213_v21 = vmul.f32 %v212_v6, %v410_v0  ;;  %v228_v22 = vstv %s405_s23 }
  0x3e   :  { %s430_s29 = sld [smem:[#allocation5 + $0x9]]  ;;  %v134_v15 = vstv %s412_s26  ;;  %v120_v27 = vmax.f32 %v119_v14, 0.0  ;;  %v220_v14 = vstv %s403_s19  ;;  %v229_v36 = vmul.f32 %v228_v22, %v410_v0 }
  0x3f   :  { %s432_s30 = sld [smem:[#allocation5 + $0xa]]  ;;  %v142_v19 = vstv %s414_s2  ;;  %v135_v24 = vadd.f32 %v134_v15, %v133_v13  ;;  %v128_v30 = vmax.f32 %v127_v18, 0.0  ;;  %v205_v13 = vmul.f32 %v204_v61, %v410_v0 }
  0x40   :  { %s435_s6 = sld [smem:[#allocation7]]  ;;  %v143_v28 = vadd.f32 %v142_v19, %v141_v16  ;;  %v150_v29 = vstv %s416_s1 }
  0x41   :  { %s440_s7 = sld [smem:[#allocation7 + $0x1]]  ;;  %v158_v35 = vstv %s419_s27  ;;  %v136_v40 = vmax.f32 %v135_v24, 0.0  ;;  %v151_v41 = vadd.f32 %v150_v29, %v149_v25  ;;  %v221_v29 = vmul.f32 %v220_v14, %v410_v0 }
  0x42   :  { %s443_s8 = sld [smem:[#allocation7 + $0x2]]  ;;  %v144_v44 = vmax.f32 %v143_v28, 0.0  ;;  %v166_v45 = vstv %s422_s28  ;;  %v159_v49 = vadd.f32 %v158_v35, %v157_v31 }
  0x43   :  { %s448_s3 = sld [smem:[#allocation7 + $0x3]]  ;;  %v174_v51 = vstv %s426_s0  ;;  %v152_v56 = vmax.f32 %v151_v41, 0.0  ;;  %v167_v57 = vadd.f32 %v166_v45, %v165_v32 }
  0x44   :  { %s451_s9 = sld [smem:[#allocation7 + $0x4]]  ;;  %v182_v59 = vstv %s430_s29  ;;  %v160_v1 = vmax.f32 %v159_v49, 0.0  ;;  %v175_v2 = vadd.f32 %v174_v51, %v173_v33 }
  0x45   :  { %s457_s11 = sld [smem:[#allocation7 + $0x5]]  ;;  %v190_v4 = vstv %s432_s30  ;;  %v168_v9 = vmax.f32 %v167_v57, 0.0  ;;  %v183_v10 = vadd.f32 %v182_v59, %v181_v52 }
  0x46   :  { %s462_s12 = sld [smem:[#allocation7 + $0x6]]  ;;  %v113_v34 = vstv %s435_s6  ;;  %v176_v17 = vmax.f32 %v175_v2, 0.0  ;;  %v191_v18 = vadd.f32 %v190_v4, %v189_v60 }
  0x47   :  { %s468_s4 = sld [smem:[#allocation5 + $0xb]]  ;;  %v114_v38 = vmul.f32 %v113_v34, %v112_v23  ;;  %v121_v39 = vstv %s440_s7  ;;  %v184_v25 = vmax.f32 %v183_v10, 0.0 }
  0x48   :  { %s471_s13 = sld [smem:[#allocation7 + $0x7]]  ;;  %v122_v42 = vmul.f32 %v121_v39, %v120_v27  ;;  %v129_v43 = vstv %s443_s8  ;;  %v192_v32 = vmax.f32 %v191_v18, 0.0 }
  0x49   :  { %s475_s21 = sld [smem:[#allocation5 + $0xc]]  ;;  %v115_v46 = vadd.f32 %v114_v38, %v107_v26  ;;  %v130_v47 = vmul.f32 %v129_v43, %v128_v30  ;;  %v137_v48 = vstv %s448_s3 }
  0x4a   :  { %s478_s14 = sld [smem:[#allocation7 + $0x8]]  ;;  %v145_v50 = vstv %s451_s9  ;;  %v138_v55 = vmul.f32 %v137_v48, %v136_v40 }
  0x4b   :  { %s484_s15 = sld [smem:[#allocation5 + $0xd]]  ;;  %v123_v54 = vadd.f32 %v122_v42, %v115_v46  ;;  %v153_v58 = vstv %s457_s11  ;;  %v146_v63 = vmul.f32 %v145_v50, %v144_v44 }
  0x4c   :  { %s486_s22 = sld [smem:[#allocation7 + $0x9]]  ;;  %v161_v3 = vstv %s462_s12  ;;  %v154_v8 = vmul.f32 %v153_v58, %v152_v56 }
  0x4d   :  { %s492_s24 = sld [smem:[#allocation5 + $0xe]]  ;;  %v131_v62 = vadd.f32 %v130_v47, %v123_v54  ;;  %v198_v12 = vstv %s468_s4  ;;  %v162_v16 = vmul.f32 %v161_v3, %v160_v1 }
  0x4e   :  { %s494_s16 = sld [smem:[#allocation7 + $0xa]]  ;;  %v169_v11 = vstv %s471_s13  ;;  %v199_v26 = vadd.f32 %v198_v12, %v197_v5 }
  0x4f   :  { %s500_s25 = sld [smem:[#allocation5 + $0xf]]  ;;  %v139_v7 = vadd.f32 %v138_v55, %v131_v62  ;;  %v206_v20 = vstv %s475_s21  ;;  %v170_v24 = vmul.f32 %v169_v11, %v168_v9 }
  0x50   :  { %s502_s17 = sld [smem:[#allocation7 + $0xb]]  ;;  %v177_v19 = vstv %s478_s14  ;;  %v207_v33 = vadd.f32 %v206_v20, %v205_v13  ;;  %v200_v39 = vmax.f32 %v199_v26, 0.0 }
  0x51   :  { %v147_v15 = vadd.f32 %v146_v63, %v139_v7  ;;  %s508_s18 = sld [smem:[#allocation7 + $0xc]]  ;;  %v214_v28 = vstv %s484_s15  ;;  %v178_v31 = vmul.f32 %v177_v19, %v176_v17 }
  0x52   :  { %s514_s26 = sld [smem:[#allocation7 + $0xd]]  ;;  %v185_v27 = vstv %s486_s22  ;;  %v215_v40 = vadd.f32 %v214_v28, %v213_v21  ;;  %v208_v45 = vmax.f32 %v207_v33, 0.0 }
  0x53   :  { %v155_v23 = vadd.f32 %v154_v8, %v147_v15  ;;  %s290_s19 = sld [smem:[#allocation7 + $0xe]]  ;;  %v222_v35 = vstv %s492_s24  ;;  %v186_v38 = vmul.f32 %v185_v27, %v184_v25 }
  0x54   :  { %v193_v34 = vstv %s494_s16  ;;  %s291_s23 = sld [smem:[#allocation7 + $0xf]]  ;;  %v223_v46 = vadd.f32 %v222_v35, %v221_v29  ;;  %v216_v50 = vmax.f32 %v215_v40, 0.0 }
  0x55   :  { %v163_v30 = vadd.f32 %v162_v16, %v155_v23  ;;  %v230_v42 = vstv %s500_s25  ;;  %v194_v44 = vmul.f32 %v193_v34, %v192_v32 }
  0x56   :  { %v201_v41 = vstv %s502_s17  ;;  %v231_v51 = vadd.f32 %v230_v42, %v229_v36  ;;  %v224_v54 = vmax.f32 %v223_v46, 0.0 }
  0x57   :  { %v171_v37 = vadd.f32 %v170_v24, %v163_v30  ;;  %v209_v47 = vstv %s508_s18  ;;  %v202_v49 = vmul.f32 %v201_v41, %v200_v39 }
  0x58   :  { %v217_v52 = vstv %s514_s26  ;;  %v210_v0 = vmul.f32 %v209_v47, %v208_v45  ;;  %v232_v58 = vmax.f32 %v231_v51, 0.0 }
  0x59   :  { %v179_v43 = vadd.f32 %v178_v31, %v171_v37  ;;  %v225_v55 = vstv %s290_s19  ;;  %v218_v57 = vmul.f32 %v217_v52, %v216_v50 }
  0x5a   :  { %v233_v59 = vstv %s291_s23  ;;  %v226_v61 = vmul.f32 %v225_v55, %v224_v54 }
  0x5b   :  { %v187_v48 = vadd.f32 %v186_v38, %v179_v43  ;;  %v234_v63 = vmul.f32 %v233_v59, %v232_v58 }
  0x5d   :  { %v195_v53 = vadd.f32 %v194_v44, %v187_v48 }
  0x5f   :  { %v203_v56 = vadd.f32 %v202_v49, %v195_v53 }
  0x61   :  { %v211_v60 = vadd.f32 %v210_v0, %v203_v56 }
  0x63   :  { %v219_v62 = vadd.f32 %v218_v57, %v211_v60 }
  0x65   :  { %v227_v1 = vadd.f32 %v226_v61, %v219_v62 }
  0x67   :  { %v235_v2 = vadd.f32 %v234_v63, %v227_v1 }
  0x69   :  { %v236_v3 = vmul.f32 0.5, %v235_v2 }
  0x6b   :  { %295 = vtanh.f32 %v236_v3 }
  0x78   :  { %v296_v4 = vpop.eup %295 }
  0x79   :  { %v238_v5 = vmul.f32 0.5, %v296_v4 }
  0x7b   :  { %v239_v6 = vadd.f32 0.5, %v238_v5 }
  0x7d   :  { %240 = vst [vmem:[%s534_s5] sm:$0x1] %v239_v6 }
  0x7e   :  { %245 = vsyncpa [#allocation4], 1 }
  0x7f   :  { %246 = vsyncpa [#allocation6], 1 }

</bundles_post_ra>
